<compile_context>
chip_gen: v7x
topology: tpu7x:2x2x1
jax: 0.10.0
libtpu: 0.0.40
codegen_flags: <defaults>
</compile_context>

<pallas_src>
import functools

import jax
import jax.numpy as jnp
from jax import lax
from jax.experimental import pallas as pl
from jax.experimental.pallas import tpu as pltpu


def _lstm_disc_kernel(x_ref, wih_ref, whh_ref, b_ref, wl_ref, bl_ref,
                      out_ref, xw_ref, hall_ref, *, T, Bp):
    """Whole-sequence LSTM + Linear(H, 1).

    x_ref   : (T*Bp, D)   flattened time-major input (row t*Bp + b)
    wih_ref : (D, 4H)     input->gates weights, gate order [i, f, o, g]
    whh_ref : (H, 4H)     hidden->gates weights, gate order [i, f, o, g]
    b_ref   : (1, 4H)     combined bias (b_ih + b_hh), gate order [i, f, o, g]
    wl_ref  : (H, 1)      final linear weight (column)
    bl_ref  : (1,)        final linear bias, SMEM scalar
    out_ref : (T*Bp, 1)   per-timestep scalar output
    xw_ref  : (T*Bp, 4H)  scratch: hoisted input projection
    hall_ref: (T*Bp, H)   scratch: all hidden states
    """
    H = whh_ref.shape[0]

    # ---- Phase 1: hoisted input projection (one large MXU matmul, off the
    #      serial critical path), bias folded in here as well. ----
    xw_ref[...] = (
        jnp.dot(x_ref[...], wih_ref[...], preferred_element_type=jnp.float32)
        + b_ref[...]
    )

    whh = whh_ref[...]  # (H, 4H), kept resident in vregs across the loop

    # ---- Phase 2: serial recurrence. Per step: one (Bp,H)x(H,4H) matmul, one
    #      sigmoid over the contiguous [i|f|o] 3H slab, one tanh on g. ----
    def step(t, carry):
        h, c = carry                                   # (Bp, H), (Bp, H)
        row = pl.multiple_of(t * Bp, Bp)               # sublane-aligned offset
        gates = xw_ref[pl.ds(row, Bp), :] + jnp.dot(
            h, whh, preferred_element_type=jnp.float32)          # (Bp, 4H)
        sig = jax.nn.sigmoid(gates[:, 0:3 * H])        # [i | f | o] in one EUP pass
        i_g = sig[:, 0:H]
        f_g = sig[:, H:2 * H]
        o_g = sig[:, 2 * H:3 * H]
        g_g = jnp.tanh(gates[:, 3 * H:4 * H])
        c_new = f_g * c + i_g * g_g
        h_new = o_g * jnp.tanh(c_new)
        hall_ref[pl.ds(row, Bp), :] = h_new            # defer output projection
        return (h_new, c_new)

    h0 = jnp.zeros((Bp, H), dtype=jnp.float32)
    c0 = jnp.zeros((Bp, H), dtype=jnp.float32)
    unroll = T if T <= 16 else 8
    lax.fori_loop(0, T, step, (h0, c0), unroll=unroll)

    # ---- Phase 3: output projection once, outside the recurrence. ----
    out_ref[...] = (
        jnp.dot(hall_ref[...], wl_ref[...], preferred_element_type=jnp.float32)
        + bl_ref[0]
    )


@jax.jit
def lstm_discriminator_forward(x, w_ih, w_hh, b_ih, b_hh, w_lin, b_lin):
    """x: (B, T, ts_dim) float32. Returns torch-equivalent output."""
    B, T, D = x.shape
    H = w_hh.shape[1]
    Bp = ((B + 7) // 8) * 8                                       # pad batch to sublanes

    # Time-major, batch padded, flattened: row index = t*Bp + b.
    x_tm = jnp.transpose(x, (1, 0, 2)).astype(jnp.float32)        # (T, B, D)
    x_tm = jnp.pad(x_tm, ((0, 0), (0, Bp - B), (0, 0)))           # (T, Bp, D)
    x_flat = x_tm.reshape(T * Bp, D)                              # (T*Bp, D)

    # PyTorch gate blocks are rows [i, f, g, o]; reorder to [i, f, o, g].
    def reorder(w):
        return jnp.concatenate([w[0:2 * H], w[3 * H:4 * H], w[2 * H:3 * H]], axis=0)

    wih_t = jnp.transpose(reorder(w_ih)).astype(jnp.float32)      # (D, 4H)
    whh_t = jnp.transpose(reorder(w_hh)).astype(jnp.float32)      # (H, 4H)
    b = reorder(b_ih + b_hh).reshape(1, 4 * H).astype(jnp.float32)
    wl = w_lin.reshape(H, 1).astype(jnp.float32)                  # (H, 1)
    bl = b_lin.reshape(1).astype(jnp.float32)                     # (1,) SMEM scalar

    kernel = functools.partial(_lstm_disc_kernel, T=T, Bp=Bp)

    out_flat = pl.pallas_call(
        kernel,
        out_shape=jax.ShapeDtypeStruct((T * Bp, 1), jnp.float32),
        in_specs=[
            pl.BlockSpec(memory_space=pltpu.MemorySpace.VMEM),    # x_flat
            pl.BlockSpec(memory_space=pltpu.MemorySpace.VMEM),    # wih_t
            pl.BlockSpec(memory_space=pltpu.MemorySpace.VMEM),    # whh_t
            pl.BlockSpec(memory_space=pltpu.MemorySpace.VMEM),    # bias
            pl.BlockSpec(memory_space=pltpu.MemorySpace.VMEM),    # wl
            pl.BlockSpec(memory_space=pltpu.MemorySpace.SMEM),    # bl (scalar)
        ],
        out_specs=pl.BlockSpec(memory_space=pltpu.MemorySpace.VMEM),
        scratch_shapes=[
            pltpu.VMEM((T * Bp, 4 * H), jnp.float32),             # xw
            pltpu.VMEM((T * Bp, H), jnp.float32),                 # h_all
        ],
    )(x_flat, wih_t, whh_t, b, wl, bl)

    out = out_flat.reshape(T, Bp, 1)[:, :B, :]                    # (T, B, 1)
    out = jnp.transpose(out, (1, 0, 2))                           # (B, T, 1)
    if B == 1:                                                    # torch.squeeze(out, dim=0)
        out = out[0]
    return out


def _reference_forward(x, w_ih, w_hh, b_ih, b_hh, w_lin, b_lin):
    """Pure-JAX reference matching PyTorch nn.LSTM + Linear semantics."""
    B, T, D = x.shape
    H = w_hh.shape[1]
    h = jnp.zeros((B, H), jnp.float32)
    c = jnp.zeros((B, H), jnp.float32)
    outs = []
    for t in range(T):
        gates = x[:, t, :] @ w_ih.T + h @ w_hh.T + b_ih + b_hh
        i_g = jax.nn.sigmoid(gates[:, 0 * H:1 * H])
        f_g = jax.nn.sigmoid(gates[:, 1 * H:2 * H])
        g_g = jnp.tanh(gates[:, 2 * H:3 * H])
        o_g = jax.nn.sigmoid(gates[:, 3 * H:4 * H])
        c = f_g * c + i_g * g_g
        h = o_g * jnp.tanh(c)
        outs.append(h @ w_lin.T + b_lin)
    out = jnp.stack(outs, axis=1)         # (B, T, 1)
    if B == 1:
        out = out[0]
    return out


if __name__ == "__main__":
    # Small shapes consistent with the module.
    B, T = 2, 8          # batch, sequence length
    ts_dim = 4           # LSTM input feature size
    H = 32               # hidden_dim

    key = jax.random.PRNGKey(0)
    k = jax.random.split(key, 7)
    scale = 1.0 / jnp.sqrt(H)
    x = jax.random.normal(k[0], (B, T, ts_dim), jnp.float32)
    w_ih = jax.random.uniform(k[1], (4 * H, ts_dim), jnp.float32, -scale, scale)
    w_hh = jax.random.uniform(k[2], (4 * H, H), jnp.float32, -scale, scale)
    b_ih = jax.random.uniform(k[3], (4 * H,), jnp.float32, -scale, scale)
    b_hh = jax.random.uniform(k[4], (4 * H,), jnp.float32, -scale, scale)
    w_lin = jax.random.uniform(k[5], (1, H), jnp.float32, -scale, scale)
    b_lin = jax.random.uniform(k[6], (1,), jnp.float32, -scale, scale)

    out = lstm_discriminator_forward(x, w_ih, w_hh, b_ih, b_hh, w_lin, b_lin)
    out = jax.block_until_ready(out)

    ref = _reference_forward(x, w_ih, w_hh, b_ih, b_hh, w_lin, b_lin)
    assert out.shape == ref.shape, (out.shape, ref.shape)
    assert jnp.allclose(out, ref, rtol=1e-4, atol=1e-4), float(jnp.max(jnp.abs(out - ref)))

    print("KERNEL_OK")
</pallas_src>

<mosaic_0001>
module attributes {stable_mosaic.version = 11 : i64} {
  func.func @_lstm_disc_kernel(%arg0: memref<64x4xf32, #tpu.memory_space<vmem>>, %arg1: memref<4x128xf32, #tpu.memory_space<vmem>>, %arg2: memref<32x128xf32, #tpu.memory_space<vmem>>, %arg3: memref<1x128xf32, #tpu.memory_space<vmem>>, %arg4: memref<32x1xf32, #tpu.memory_space<vmem>>, %arg5: memref<1xf32, #tpu.memory_space<smem>>, %arg6: memref<64x1xf32, #tpu.memory_space<vmem>>, %arg7: memref<64x128xf32, #tpu.memory_space<vmem>>, %arg8: memref<64x32xf32, #tpu.memory_space<vmem>>) attributes {dimension_semantics = [], scalar_prefetch = 0 : i64, scratch_operands = 2 : i64, tpu.core_type = #tpu.core_type<tc>} {
    %c0 = arith.constant 0 : index
    %c0_0 = arith.constant 0 : index
    %0 = vector.load %arg0[%c0, %c0_0] : memref<64x4xf32, #tpu.memory_space<vmem>>, vector<64x4xf32>
    %c0_1 = arith.constant 0 : index
    %c0_2 = arith.constant 0 : index
    %1 = vector.load %arg1[%c0_1, %c0_2] : memref<4x128xf32, #tpu.memory_space<vmem>>, vector<4x128xf32>
    %cst = arith.constant dense<0.000000e+00> : vector<64x128xf32>
    %2 = tpu.matmul %0, %1, %cst {dimension_numbers = #tpu.dot_dimension_numbers<[1], [0], [0], [1], [0, 0, 1, 1], [], []>} : vector<64x4xf32>, vector<4x128xf32>, vector<64x128xf32> -> vector<64x128xf32>
    %c0_3 = arith.constant 0 : index
    %c0_4 = arith.constant 0 : index
    %3 = vector.load %arg3[%c0_3, %c0_4] : memref<1x128xf32, #tpu.memory_space<vmem>>, vector<1x128xf32>
    %4 = vector.broadcast %3 : vector<1x128xf32> to vector<64x128xf32>
    %5 = arith.addf %2, %4 : vector<64x128xf32>
    %c0_5 = arith.constant 0 : index
    %c0_6 = arith.constant 0 : index
    %6 = vector.load %arg7[%c0_5, %c0_6] : memref<64x128xf32, #tpu.memory_space<vmem>>, vector<64x128xf32>
    tpu.vector_store %arg7[%c0_5, %c0_6], %5 {strides = array<i32>} : memref<64x128xf32, #tpu.memory_space<vmem>>, vector<64x128xf32>,
    %c0_7 = arith.constant 0 : index
    %c0_8 = arith.constant 0 : index
    %7 = vector.load %arg2[%c0_7, %c0_8] : memref<32x128xf32, #tpu.memory_space<vmem>>, vector<32x128xf32>
    %cst_9 = arith.constant 0.000000e+00 : f32
    %8 = vector.broadcast %cst_9 : f32 to vector<8x32xf32>
    %cst_10 = arith.constant 0.000000e+00 : f32
    %9 = vector.broadcast %cst_10 : f32 to vector<8x32xf32>
    %c0_i32 = arith.constant 0 : i32
    %c8_i32 = arith.constant 8 : i32
    %10 = arith.muli %c0_i32, %c8_i32 : i32
    %11 = tpu.assume_multiple %10, 8 : i32
    %12 = arith.index_cast %11 : i32 to index
    %c0_11 = arith.constant 0 : index
    %13 = vector.load %arg7[%12, %c0_11] : memref<64x128xf32, #tpu.memory_space<vmem>>, vector<8x128xf32>
    %cst_12 = arith.constant dense<0.000000e+00> : vector<8x128xf32>
    %14 = tpu.matmul %8, %7, %cst_12 {dimension_numbers = #tpu.dot_dimension_numbers<[1], [0], [0], [1], [0, 0, 1, 1], [], []>} : vector<8x32xf32>, vector<32x128xf32>, vector<8x128xf32> -> vector<8x128xf32>
    %15 = arith.addf %13, %14 : vector<8x128xf32>
    %16 = vector.extract_strided_slice %15 {offsets = [0, 0], sizes = [8, 96], strides = [1, 1]} : vector<8x128xf32> to vector<8x96xf32>
    %17 = arith.negf %16 : vector<8x96xf32>
    %18 = math.exp %17 : vector<8x96xf32>
    %cst_13 = arith.constant 1.000000e+00 : f32
    %19 = vector.broadcast %cst_13 : f32 to vector<8x96xf32>
    %20 = arith.addf %19, %18 : vector<8x96xf32>
    %21 = arith.divf %19, %20 : vector<8x96xf32>
    %22 = vector.extract_strided_slice %21 {offsets = [0, 0], sizes = [8, 32], strides = [1, 1]} : vector<8x96xf32> to vector<8x32xf32>
    %23 = vector.extract_strided_slice %21 {offsets = [0, 32], sizes = [8, 32], strides = [1, 1]} : vector<8x96xf32> to vector<8x32xf32>
    %24 = vector.extract_strided_slice %21 {offsets = [0, 64], sizes = [8, 32], strides = [1, 1]} : vector<8x96xf32> to vector<8x32xf32>
    %25 = vector.extract_strided_slice %15 {offsets = [0, 96], sizes = [8, 32], strides = [1, 1]} : vector<8x128xf32> to vector<8x32xf32>
    %26 = math.tanh %25 : vector<8x32xf32>
    %27 = arith.mulf %23, %9 : vector<8x32xf32>
    %28 = arith.mulf %22, %26 : vector<8x32xf32>
    %29 = arith.addf %27, %28 : vector<8x32xf32>
    %30 = math.tanh %29 : vector<8x32xf32>
    %31 = arith.mulf %24, %30 : vector<8x32xf32>
    %32 = arith.index_cast %11 : i32 to index
    %c0_14 = arith.constant 0 : index
    %33 = vector.load %arg8[%32, %c0_14] : memref<64x32xf32, #tpu.memory_space<vmem>>, vector<8x32xf32>
    tpu.vector_store %arg8[%32, %c0_14], %31 {strides = array<i32>} : memref<64x32xf32, #tpu.memory_space<vmem>>, vector<8x32xf32>,
    %c1_i32 = arith.constant 1 : i32
    %c8_i32_15 = arith.constant 8 : i32
    %34 = arith.muli %c1_i32, %c8_i32_15 : i32
    %35 = tpu.assume_multiple %34, 8 : i32
    %36 = arith.index_cast %35 : i32 to index
    %c0_16 = arith.constant 0 : index
    %37 = vector.load %arg7[%36, %c0_16] : memref<64x128xf32, #tpu.memory_space<vmem>>, vector<8x128xf32>
    %cst_17 = arith.constant dense<0.000000e+00> : vector<8x128xf32>
    %38 = tpu.matmul %31, %7, %cst_17 {dimension_numbers = #tpu.dot_dimension_numbers<[1], [0], [0], [1], [0, 0, 1, 1], [], []>} : vector<8x32xf32>, vector<32x128xf32>, vector<8x128xf32> -> vector<8x128xf32>
    %39 = arith.addf %37, %38 : vector<8x128xf32>
    %40 = vector.extract_strided_slice %39 {offsets = [0, 0], sizes = [8, 96], strides = [1, 1]} : vector<8x128xf32> to vector<8x96xf32>
    %41 = arith.negf %40 : vector<8x96xf32>
    %42 = math.exp %41 : vector<8x96xf32>
    %cst_18 = arith.constant 1.000000e+00 : f32
    %43 = vector.broadcast %cst_18 : f32 to vector<8x96xf32>
    %44 = arith.addf %43, %42 : vector<8x96xf32>
    %45 = arith.divf %43, %44 : vector<8x96xf32>
    %46 = vector.extract_strided_slice %45 {offsets = [0, 0], sizes = [8, 32], strides = [1, 1]} : vector<8x96xf32> to vector<8x32xf32>
    %47 = vector.extract_strided_slice %45 {offsets = [0, 32], sizes = [8, 32], strides = [1, 1]} : vector<8x96xf32> to vector<8x32xf32>
    %48 = vector.extract_strided_slice %45 {offsets = [0, 64], sizes = [8, 32], strides = [1, 1]} : vector<8x96xf32> to vector<8x32xf32>
    %49 = vector.extract_strided_slice %39 {offsets = [0, 96], sizes = [8, 32], strides = [1, 1]} : vector<8x128xf32> to vector<8x32xf32>
    %50 = math.tanh %49 : vector<8x32xf32>
    %51 = arith.mulf %47, %29 : vector<8x32xf32>
    %52 = arith.mulf %46, %50 : vector<8x32xf32>
    %53 = arith.addf %51, %52 : vector<8x32xf32>
    %54 = math.tanh %53 : vector<8x32xf32>
    %55 = arith.mulf %48, %54 : vector<8x32xf32>
    %56 = arith.index_cast %35 : i32 to index
    %c0_19 = arith.constant 0 : index
    %57 = vector.load %arg8[%56, %c0_19] : memref<64x32xf32, #tpu.memory_space<vmem>>, vector<8x32xf32>
    tpu.vector_store %arg8[%56, %c0_19], %55 {strides = array<i32>} : memref<64x32xf32, #tpu.memory_space<vmem>>, vector<8x32xf32>,
    %c2_i32 = arith.constant 2 : i32
    %c8_i32_20 = arith.constant 8 : i32
    %58 = arith.muli %c2_i32, %c8_i32_20 : i32
    %59 = tpu.assume_multiple %58, 8 : i32
    %60 = arith.index_cast %59 : i32 to index
    %c0_21 = arith.constant 0 : index
    %61 = vector.load %arg7[%60, %c0_21] : memref<64x128xf32, #tpu.memory_space<vmem>>, vector<8x128xf32>
    %cst_22 = arith.constant dense<0.000000e+00> : vector<8x128xf32>
    %62 = tpu.matmul %55, %7, %cst_22 {dimension_numbers = #tpu.dot_dimension_numbers<[1], [0], [0], [1], [0, 0, 1, 1], [], []>} : vector<8x32xf32>, vector<32x128xf32>, vector<8x128xf32> -> vector<8x128xf32>
    %63 = arith.addf %61, %62 : vector<8x128xf32>
    %64 = vector.extract_strided_slice %63 {offsets = [0, 0], sizes = [8, 96], strides = [1, 1]} : vector<8x128xf32> to vector<8x96xf32>
    %65 = arith.negf %64 : vector<8x96xf32>
    %66 = math.exp %65 : vector<8x96xf32>
    %cst_23 = arith.constant 1.000000e+00 : f32
    %67 = vector.broadcast %cst_23 : f32 to vector<8x96xf32>
    %68 = arith.addf %67, %66 : vector<8x96xf32>
    %69 = arith.divf %67, %68 : vector<8x96xf32>
    %70 = vector.extract_strided_slice %69 {offsets = [0, 0], sizes = [8, 32], strides = [1, 1]} : vector<8x96xf32> to vector<8x32xf32>
    %71 = vector.extract_strided_slice %69 {offsets = [0, 32], sizes = [8, 32], strides = [1, 1]} : vector<8x96xf32> to vector<8x32xf32>
    %72 = vector.extract_strided_slice %69 {offsets = [0, 64], sizes = [8, 32], strides = [1, 1]} : vector<8x96xf32> to vector<8x32xf32>
    %73 = vector.extract_strided_slice %63 {offsets = [0, 96], sizes = [8, 32], strides = [1, 1]} : vector<8x128xf32> to vector<8x32xf32>
    %74 = math.tanh %73 : vector<8x32xf32>
    %75 = arith.mulf %71, %53 : vector<8x32xf32>
    %76 = arith.mulf %70, %74 : vector<8x32xf32>
    %77 = arith.addf %75, %76 : vector<8x32xf32>
    %78 = math.tanh %77 : vector<8x32xf32>
    %79 = arith.mulf %72, %78 : vector<8x32xf32>
    %80 = arith.index_cast %59 : i32 to index
    %c0_24 = arith.constant 0 : index
    %81 = vector.load %arg8[%80, %c0_24] : memref<64x32xf32, #tpu.memory_space<vmem>>, vector<8x32xf32>
    tpu.vector_store %arg8[%80, %c0_24], %79 {strides = array<i32>} : memref<64x32xf32, #tpu.memory_space<vmem>>, vector<8x32xf32>,
    %c3_i32 = arith.constant 3 : i32
    %c8_i32_25 = arith.constant 8 : i32
    %82 = arith.muli %c3_i32, %c8_i32_25 : i32
    %83 = tpu.assume_multiple %82, 8 : i32
    %84 = arith.index_cast %83 : i32 to index
    %c0_26 = arith.constant 0 : index
    %85 = vector.load %arg7[%84, %c0_26] : memref<64x128xf32, #tpu.memory_space<vmem>>, vector<8x128xf32>
    %cst_27 = arith.constant dense<0.000000e+00> : vector<8x128xf32>
    %86 = tpu.matmul %79, %7, %cst_27 {dimension_numbers = #tpu.dot_dimension_numbers<[1], [0], [0], [1], [0, 0, 1, 1], [], []>} : vector<8x32xf32>, vector<32x128xf32>, vector<8x128xf32> -> vector<8x128xf32>
    %87 = arith.addf %85, %86 : vector<8x128xf32>
    %88 = vector.extract_strided_slice %87 {offsets = [0, 0], sizes = [8, 96], strides = [1, 1]} : vector<8x128xf32> to vector<8x96xf32>
    %89 = arith.negf %88 : vector<8x96xf32>
    %90 = math.exp %89 : vector<8x96xf32>
    %cst_28 = arith.constant 1.000000e+00 : f32
    %91 = vector.broadcast %cst_28 : f32 to vector<8x96xf32>
    %92 = arith.addf %91, %90 : vector<8x96xf32>
    %93 = arith.divf %91, %92 : vector<8x96xf32>
    %94 = vector.extract_strided_slice %93 {offsets = [0, 0], sizes = [8, 32], strides = [1, 1]} : vector<8x96xf32> to vector<8x32xf32>
    %95 = vector.extract_strided_slice %93 {offsets = [0, 32], sizes = [8, 32], strides = [1, 1]} : vector<8x96xf32> to vector<8x32xf32>
    %96 = vector.extract_strided_slice %93 {offsets = [0, 64], sizes = [8, 32], strides = [1, 1]} : vector<8x96xf32> to vector<8x32xf32>
    %97 = vector.extract_strided_slice %87 {offsets = [0, 96], sizes = [8, 32], strides = [1, 1]} : vector<8x128xf32> to vector<8x32xf32>
    %98 = math.tanh %97 : vector<8x32xf32>
    %99 = arith.mulf %95, %77 : vector<8x32xf32>
    %100 = arith.mulf %94, %98 : vector<8x32xf32>
    %101 = arith.addf %99, %100 : vector<8x32xf32>
    %102 = math.tanh %101 : vector<8x32xf32>
    %103 = arith.mulf %96, %102 : vector<8x32xf32>
    %104 = arith.index_cast %83 : i32 to index
    %c0_29 = arith.constant 0 : index
    %105 = vector.load %arg8[%104, %c0_29] : memref<64x32xf32, #tpu.memory_space<vmem>>, vector<8x32xf32>
    tpu.vector_store %arg8[%104, %c0_29], %103 {strides = array<i32>} : memref<64x32xf32, #tpu.memory_space<vmem>>, vector<8x32xf32>,
    %c4_i32 = arith.constant 4 : i32
    %c8_i32_30 = arith.constant 8 : i32
    %106 = arith.muli %c4_i32, %c8_i32_30 : i32
    %107 = tpu.assume_multiple %106, 8 : i32
    %108 = arith.index_cast %107 : i32 to index
    %c0_31 = arith.constant 0 : index
    %109 = vector.load %arg7[%108, %c0_31] : memref<64x128xf32, #tpu.memory_space<vmem>>, vector<8x128xf32>
    %cst_32 = arith.constant dense<0.000000e+00> : vector<8x128xf32>
    %110 = tpu.matmul %103, %7, %cst_32 {dimension_numbers = #tpu.dot_dimension_numbers<[1], [0], [0], [1], [0, 0, 1, 1], [], []>} : vector<8x32xf32>, vector<32x128xf32>, vector<8x128xf32> -> vector<8x128xf32>
    %111 = arith.addf %109, %110 : vector<8x128xf32>
    %112 = vector.extract_strided_slice %111 {offsets = [0, 0], sizes = [8, 96], strides = [1, 1]} : vector<8x128xf32> to vector<8x96xf32>
    %113 = arith.negf %112 : vector<8x96xf32>
    %114 = math.exp %113 : vector<8x96xf32>
    %cst_33 = arith.constant 1.000000e+00 : f32
    %115 = vector.broadcast %cst_33 : f32 to vector<8x96xf32>
    %116 = arith.addf %115, %114 : vector<8x96xf32>
    %117 = arith.divf %115, %116 : vector<8x96xf32>
    %118 = vector.extract_strided_slice %117 {offsets = [0, 0], sizes = [8, 32], strides = [1, 1]} : vector<8x96xf32> to vector<8x32xf32>
    %119 = vector.extract_strided_slice %117 {offsets = [0, 32], sizes = [8, 32], strides = [1, 1]} : vector<8x96xf32> to vector<8x32xf32>
    %120 = vector.extract_strided_slice %117 {offsets = [0, 64], sizes = [8, 32], strides = [1, 1]} : vector<8x96xf32> to vector<8x32xf32>
    %121 = vector.extract_strided_slice %111 {offsets = [0, 96], sizes = [8, 32], strides = [1, 1]} : vector<8x128xf32> to vector<8x32xf32>
    %122 = math.tanh %121 : vector<8x32xf32>
    %123 = arith.mulf %119, %101 : vector<8x32xf32>
    %124 = arith.mulf %118, %122 : vector<8x32xf32>
    %125 = arith.addf %123, %124 : vector<8x32xf32>
    %126 = math.tanh %125 : vector<8x32xf32>
    %127 = arith.mulf %120, %126 : vector<8x32xf32>
    %128 = arith.index_cast %107 : i32 to index
    %c0_34 = arith.constant 0 : index
    %129 = vector.load %arg8[%128, %c0_34] : memref<64x32xf32, #tpu.memory_space<vmem>>, vector<8x32xf32>
    tpu.vector_store %arg8[%128, %c0_34], %127 {strides = array<i32>} : memref<64x32xf32, #tpu.memory_space<vmem>>, vector<8x32xf32>,
    %c5_i32 = arith.constant 5 : i32
    %c8_i32_35 = arith.constant 8 : i32
    %130 = arith.muli %c5_i32, %c8_i32_35 : i32
    %131 = tpu.assume_multiple %130, 8 : i32
    %132 = arith.index_cast %131 : i32 to index
    %c0_36 = arith.constant 0 : index
    %133 = vector.load %arg7[%132, %c0_36] : memref<64x128xf32, #tpu.memory_space<vmem>>, vector<8x128xf32>
    %cst_37 = arith.constant dense<0.000000e+00> : vector<8x128xf32>
    %134 = tpu.matmul %127, %7, %cst_37 {dimension_numbers = #tpu.dot_dimension_numbers<[1], [0], [0], [1], [0, 0, 1, 1], [], []>} : vector<8x32xf32>, vector<32x128xf32>, vector<8x128xf32> -> vector<8x128xf32>
    %135 = arith.addf %133, %134 : vector<8x128xf32>
    %136 = vector.extract_strided_slice %135 {offsets = [0, 0], sizes = [8, 96], strides = [1, 1]} : vector<8x128xf32> to vector<8x96xf32>
    %137 = arith.negf %136 : vector<8x96xf32>
    %138 = math.exp %137 : vector<8x96xf32>
    %cst_38 = arith.constant 1.000000e+00 : f32
    %139 = vector.broadcast %cst_38 : f32 to vector<8x96xf32>
    %140 = arith.addf %139, %138 : vector<8x96xf32>
    %141 = arith.divf %139, %140 : vector<8x96xf32>
    %142 = vector.extract_strided_slice %141 {offsets = [0, 0], sizes = [8, 32], strides = [1, 1]} : vector<8x96xf32> to vector<8x32xf32>
    %143 = vector.extract_strided_slice %141 {offsets = [0, 32], sizes = [8, 32], strides = [1, 1]} : vector<8x96xf32> to vector<8x32xf32>
    %144 = vector.extract_strided_slice %141 {offsets = [0, 64], sizes = [8, 32], strides = [1, 1]} : vector<8x96xf32> to vector<8x32xf32>
    %145 = vector.extract_strided_slice %135 {offsets = [0, 96], sizes = [8, 32], strides = [1, 1]} : vector<8x128xf32> to vector<8x32xf32>
    %146 = math.tanh %145 : vector<8x32xf32>
    %147 = arith.mulf %143, %125 : vector<8x32xf32>
    %148 = arith.mulf %142, %146 : vector<8x32xf32>
    %149 = arith.addf %147, %148 : vector<8x32xf32>
    %150 = math.tanh %149 : vector<8x32xf32>
    %151 = arith.mulf %144, %150 : vector<8x32xf32>
    %152 = arith.index_cast %131 : i32 to index
    %c0_39 = arith.constant 0 : index
    %153 = vector.load %arg8[%152, %c0_39] : memref<64x32xf32, #tpu.memory_space<vmem>>, vector<8x32xf32>
    tpu.vector_store %arg8[%152, %c0_39], %151 {strides = array<i32>} : memref<64x32xf32, #tpu.memory_space<vmem>>, vector<8x32xf32>,
    %c6_i32 = arith.constant 6 : i32
    %c8_i32_40 = arith.constant 8 : i32
    %154 = arith.muli %c6_i32, %c8_i32_40 : i32
    %155 = tpu.assume_multiple %154, 8 : i32
    %156 = arith.index_cast %155 : i32 to index
    %c0_41 = arith.constant 0 : index
    %157 = vector.load %arg7[%156, %c0_41] : memref<64x128xf32, #tpu.memory_space<vmem>>, vector<8x128xf32>
    %cst_42 = arith.constant dense<0.000000e+00> : vector<8x128xf32>
    %158 = tpu.matmul %151, %7, %cst_42 {dimension_numbers = #tpu.dot_dimension_numbers<[1], [0], [0], [1], [0, 0, 1, 1], [], []>} : vector<8x32xf32>, vector<32x128xf32>, vector<8x128xf32> -> vector<8x128xf32>
    %159 = arith.addf %157, %158 : vector<8x128xf32>
    %160 = vector.extract_strided_slice %159 {offsets = [0, 0], sizes = [8, 96], strides = [1, 1]} : vector<8x128xf32> to vector<8x96xf32>
    %161 = arith.negf %160 : vector<8x96xf32>
    %162 = math.exp %161 : vector<8x96xf32>
    %cst_43 = arith.constant 1.000000e+00 : f32
    %163 = vector.broadcast %cst_43 : f32 to vector<8x96xf32>
    %164 = arith.addf %163, %162 : vector<8x96xf32>
    %165 = arith.divf %163, %164 : vector<8x96xf32>
    %166 = vector.extract_strided_slice %165 {offsets = [0, 0], sizes = [8, 32], strides = [1, 1]} : vector<8x96xf32> to vector<8x32xf32>
    %167 = vector.extract_strided_slice %165 {offsets = [0, 32], sizes = [8, 32], strides = [1, 1]} : vector<8x96xf32> to vector<8x32xf32>
    %168 = vector.extract_strided_slice %165 {offsets = [0, 64], sizes = [8, 32], strides = [1, 1]} : vector<8x96xf32> to vector<8x32xf32>
    %169 = vector.extract_strided_slice %159 {offsets = [0, 96], sizes = [8, 32], strides = [1, 1]} : vector<8x128xf32> to vector<8x32xf32>
    %170 = math.tanh %169 : vector<8x32xf32>
    %171 = arith.mulf %167, %149 : vector<8x32xf32>
    %172 = arith.mulf %166, %170 : vector<8x32xf32>
    %173 = arith.addf %171, %172 : vector<8x32xf32>
    %174 = math.tanh %173 : vector<8x32xf32>
    %175 = arith.mulf %168, %174 : vector<8x32xf32>
    %176 = arith.index_cast %155 : i32 to index
    %c0_44 = arith.constant 0 : index
    %177 = vector.load %arg8[%176, %c0_44] : memref<64x32xf32, #tpu.memory_space<vmem>>, vector<8x32xf32>
    tpu.vector_store %arg8[%176, %c0_44], %175 {strides = array<i32>} : memref<64x32xf32, #tpu.memory_space<vmem>>, vector<8x32xf32>,
    %c7_i32 = arith.constant 7 : i32
    %c8_i32_45 = arith.constant 8 : i32
    %178 = arith.muli %c7_i32, %c8_i32_45 : i32
    %179 = tpu.assume_multiple %178, 8 : i32
    %180 = arith.index_cast %179 : i32 to index
    %c0_46 = arith.constant 0 : index
    %181 = vector.load %arg7[%180, %c0_46] : memref<64x128xf32, #tpu.memory_space<vmem>>, vector<8x128xf32>
    %cst_47 = arith.constant dense<0.000000e+00> : vector<8x128xf32>
    %182 = tpu.matmul %175, %7, %cst_47 {dimension_numbers = #tpu.dot_dimension_numbers<[1], [0], [0], [1], [0, 0, 1, 1], [], []>} : vector<8x32xf32>, vector<32x128xf32>, vector<8x128xf32> -> vector<8x128xf32>
    %183 = arith.addf %181, %182 : vector<8x128xf32>
    %184 = vector.extract_strided_slice %183 {offsets = [0, 0], sizes = [8, 96], strides = [1, 1]} : vector<8x128xf32> to vector<8x96xf32>
    %185 = arith.negf %184 : vector<8x96xf32>
    %186 = math.exp %185 : vector<8x96xf32>
    %cst_48 = arith.constant 1.000000e+00 : f32
    %187 = vector.broadcast %cst_48 : f32 to vector<8x96xf32>
    %188 = arith.addf %187, %186 : vector<8x96xf32>
    %189 = arith.divf %187, %188 : vector<8x96xf32>
    %190 = vector.extract_strided_slice %189 {offsets = [0, 0], sizes = [8, 32], strides = [1, 1]} : vector<8x96xf32> to vector<8x32xf32>
    %191 = vector.extract_strided_slice %189 {offsets = [0, 32], sizes = [8, 32], strides = [1, 1]} : vector<8x96xf32> to vector<8x32xf32>
    %192 = vector.extract_strided_slice %189 {offsets = [0, 64], sizes = [8, 32], strides = [1, 1]} : vector<8x96xf32> to vector<8x32xf32>
    %193 = vector.extract_strided_slice %183 {offsets = [0, 96], sizes = [8, 32], strides = [1, 1]} : vector<8x128xf32> to vector<8x32xf32>
    %194 = math.tanh %193 : vector<8x32xf32>
    %195 = arith.mulf %191, %173 : vector<8x32xf32>
    %196 = arith.mulf %190, %194 : vector<8x32xf32>
    %197 = arith.addf %195, %196 : vector<8x32xf32>
    %198 = math.tanh %197 : vector<8x32xf32>
    %199 = arith.mulf %192, %198 : vector<8x32xf32>
    %200 = arith.index_cast %179 : i32 to index
    %c0_49 = arith.constant 0 : index
    %201 = vector.load %arg8[%200, %c0_49] : memref<64x32xf32, #tpu.memory_space<vmem>>, vector<8x32xf32>
    tpu.vector_store %arg8[%200, %c0_49], %199 {strides = array<i32>} : memref<64x32xf32, #tpu.memory_space<vmem>>, vector<8x32xf32>,
    %c8_i32_50 = arith.constant 8 : i32
    %c0_51 = arith.constant 0 : index
    %c0_52 = arith.constant 0 : index
    %202 = vector.load %arg8[%c0_51, %c0_52] : memref<64x32xf32, #tpu.memory_space<vmem>>, vector<64x32xf32>
    %c0_53 = arith.constant 0 : index
    %c0_54 = arith.constant 0 : index
    %203 = vector.load %arg4[%c0_53, %c0_54] : memref<32x1xf32, #tpu.memory_space<vmem>>, vector<32x1xf32>
    %cst_55 = arith.constant dense<0.000000e+00> : vector<64x1xf32>
    %204 = tpu.matmul %202, %203, %cst_55 {dimension_numbers = #tpu.dot_dimension_numbers<[1], [0], [0], [1], [0, 0, 1, 1], [], []>} : vector<64x32xf32>, vector<32x1xf32>, vector<64x1xf32> -> vector<64x1xf32>
    %c0_56 = arith.constant 0 : index
    %205 = memref.load %arg5[%c0_56] : memref<1xf32, #tpu.memory_space<smem>>
    %206 = vector.broadcast %205 : f32 to vector<64x1xf32>
    %207 = arith.addf %204, %206 : vector<64x1xf32>
    %c0_57 = arith.constant 0 : index
    %c0_58 = arith.constant 0 : index
    %208 = vector.load %arg6[%c0_57, %c0_58] : memref<64x1xf32, #tpu.memory_space<vmem>>, vector<64x1xf32>
    tpu.vector_store %arg6[%c0_57, %c0_58], %207 {strides = array<i32>} : memref<64x1xf32, #tpu.memory_space<vmem>>, vector<64x1xf32>,
    return
  }
}

</mosaic_0001>

<bundles_post_ra>
// kernel: lstm_discriminator_forward.1
= control target key start
LH: loop header
LB: loop body
LE: loop exit
PB: predicated region body
PF: predicated region fallthrough
CT: control target
= control target key end

     0   :  { %vm65_vm0 = vcmask 1043456   ;;  %vm40_vm1 = vcmask 31744   ;;  %v1525_v8 = vmov 0.0|0.0   ;;  %vm1526_vm2 = vmmov 0   ;;  %s1528_s19 = smov 32   ;;  %s1810_s1 = inlined_call_operand.vmem [shape: f32[4,128], index: 1, kind: input, shape index: {}]   ;;  %s1811_s0 = inlined_call_operand.vmem [shape: f32[64,4], index: 0, kind: input, shape index: {}]   ;;  %s1812_s2 = inlined_call_operand.vmem [shape: f32[32,128], index: 2, kind: input, shape index: {}]   ;;  %s1813_s3 = inlined_call_operand.vmem [shape: f32[1,128], index: 3, kind: input, shape index: {}]   ;;  %s1814_s4 = inlined_call_operand.vmem [shape: f32[32,1], index: 4, kind: input, shape index: {}]   ;;  %s1815_s5 = inlined_call_operand.<no memory space> [shape: f32[1], index: 5, kind: input, shape index: {}]   ;;  %s1816_s6 = inlined_call_operand.vmem [shape: f32[64,1], index: 6, kind: output, shape index: {}]  }
   0x1   :  { %v32_v0 = vld [vmem:[%s1810_s1] sm:$0xf]  ;;  %v29_v2 = vld [vmem:[%s1811_s0 + $0x28] sm:$0xff]  ;;  %v30_v5 = vld [vmem:[%s1811_s0 + $0x30] sm:$0xff]  ;;  %v1527_v14 = vmov 0.0   ;;  %vm187_vm3 = vcmask 261120  }
   0x2   :  { %v28_v1 = vld [vmem:[%s1811_s0 + $0x20] sm:$0xff]  ;;  %1454 = vmatprep.subr.msk.mxu1 %vm65_vm0, %v32_v0  ;;  %v183_v4 = vld [vmem:[%s1812_s2 + $0x8] sm:$0xff]  ;;  %1276 = vmatprep.subr.msk.mxu0 %vm65_vm0, %v32_v0  ;;  %v184_v10 = vld [vmem:[%s1812_s2 + $0x10] sm:$0xff]  ;;  %vm1169_vm4 = vcmask 7168  }
   0x3   :  { %1284 = vmatprep.mubr.msk.f32.mxu1 %vm40_vm1, %v28_v1  ;;  %v182_v3 = vld [vmem:[%s1812_s2] sm:$0xff]  ;;  %1455 = vmatpush3.msk.msra.mxu1 %vm65_vm0, %v32_v0  ;;  %v25_v9 = vld [vmem:[%s1811_s0 + $0x8] sm:$0xff]  ;;  %v185_v11 = vld [vmem:[%s1812_s2 + $0x18] sm:$0xff] }
   0x4   :  { %v1586_v6 = vpack.c.bf16 %v183_v4, %v182_v3  ;;  %v24_v7 = vld [vmem:[%s1811_s0] sm:$0xff]  ;;  %1285 = vmatmul.mubr.msk.f32.vlgmr.msra.gmra.mrb[0].mxu1 %vm40_vm1, %v29_v2  ;;  %1398 = vmatprep.subr.bf16.mxu1 %v1525_v8  ;;  %v31_v12 = vld [vmem:[%s1811_s0 + $0x38] sm:$0xff]  ;;  %v1608_v13 = vpack.c.bf16 %v185_v11, %v184_v10  ;;  %v26_v54 = vld [vmem:[%s1811_s0 + $0x10] sm:$0xff] }
   0x5   :  { %1287 = vmatprep.mubr.msk.f32.mxu1 %vm40_vm1, %v30_v5  ;;  %1277 = vmatpush3.msk.msra.mxu0 %vm65_vm0, %v32_v0  ;;  %v1638_v18 = vld [vmem:[%s1813_s3] ss:$0 sm:$0xff]  ;;  %s1529_s3 = smov 64   ;;  %v27_v55 = vld [vmem:[%s1811_s0 + $0x18] sm:$0xff] }
   0x6   :  { %1400 = vmatpush3.bf16.msra.mxu1 %v1586_v6  ;;  %1278 = vmatprep.mubr.msk.f32.mxu0 %vm40_vm1, %v24_v7 }
   0x7   :  { %1401 = vmatprep.subr.bf16.mxu1 %v1525_v8  ;;  %1279 = vmatmul.mubr.msk.f32.vlgmr.msra.gmra.mrb[0].mxu0 %vm40_vm1, %v25_v9 }
   0x8   :  { %1288 = vmatmul.mubr.msk.f32.gmra.mrb[2].mxu1 %vm40_vm1, %v31_v12  ;;  %1410 = vmatprep.subr.bf16.mxu0 %v1525_v8 }
   0x9   :  { %1298 = vmatprep.mubr.msk.f32.mxu1 %vm1526_vm2, %v1527_v14  ;;  %1412 = vmatpush3.bf16.msra.mxu0 %v1586_v6 }
   0xa   :  { %1403 = vmatpush3.bf16.msra.mxu1 %v1608_v13  ;;  %1413 = vmatprep.subr.bf16.mxu0 %v1525_v8 }
   0xb   :  { %1404 = vmatprep.subr.bf16.mxu1 %v1525_v8  ;;  %1281 = vmatprep.mubr.msk.f32.mxu0 %vm40_vm1, %v26_v54 }
   0xc   :  { %1282 = vmatmul.mubr.msk.f32.gmra.mrb[2].mxu0 %vm40_vm1, %v27_v55 }
   0xd   :  { %1299 = vmatmul.mubr.f32.vlgmr.msra.gmra.mrb[4].mxu1 %v1527_v14  ;;  %1415 = vmatpush3.bf16.msra.mxu0 %v1608_v13 }
   0xe   :  { %1406 = vmatpush3.bf16.msra.mxu1 %v1586_v6  ;;  %1309 = vmatprep.mubr.msk.f32.mxu1 %vm1526_vm2, %v1527_v14 }
   0xf   :  { %1407 = vmatprep.subr.bf16.mxu1 %v1525_v8  ;;  %1422 = vmatprep.subr.bf16.mxu0 %v1525_v8 }
  0x10   :  { %1320 = vmatprep.mubr.msk.f32.mxu0 %vm1526_vm2, %v1527_v14 }
  0x12   :  { %1409 = vmatpush3.bf16.msra.mxu1 %v1608_v13 }
  0x13   :  { %1416 = vmatprep.subr.bf16.mxu1 %v1525_v8 }
  0xd7   :  { %v1631_v15 = vpop.f32.mrb[0].mxu1 }
  0xd8   :  { %v1633_v16 = vpop.f32.mrb[1].mxu1 }
  0xda   :  { %v1280_v17 = vpop.f32.mrb[0].mxu0 }
  0xdb   :  { %v1640_v19 = vpop.f32.mrb[2].mxu1  ;;  %v135_v20 = vpop.f32.mrb[1].mxu0  ;;  %v141_v40 = vadd.f32 %v1280_v17, %v1638_v18 }
  0xdc   :  { %v1642_v21 = vpop.f32.mrb[3].mxu1  ;;  %v136_v22 = vadd.f32 %v1638_v18, %v135_v20 }
  0xdf   :  { %v1283_v59 = vpop.f32.mrb[2].mxu0 }
  0xe0   :  { %v257_v23 = vpop.f32.mrb[4].mxu1  ;;  %v145_v60 = vpop.f32.mrb[3].mxu0 }
  0xe1   :  { %v261_v24 = vadd.f32 %v257_v23, %v136_v22  ;;  %v1300_v25 = vpop.f32.mrb[5].mxu1  ;;  %v146_v62 = vadd.f32 %v1638_v18, %v145_v60  ;;  %v161_v60 = vadd.f32 %v1631_v15, %v1638_v18 }
  0xe2   :  { %v151_v25 = vadd.f32 %v1283_v59, %v1638_v18 }
  0xe3   :  { %1461 = vtanh.f32 %v261_v24  ;;  %v1192_v27 = vmul.f32 -1.442695, %v261_v24 }
  0xe5   :  { %1463 = vpow2.f32 %v1192_v27 }
  0xed   :  { %v1462_v26 = vpop.eup %1461 }
  0xee   :  { %271 = vrot.lane.b32.xlu0 %v1462_v26, %s1528_s19 }
  0xef   :  { %v1464_v28 = vpop.eup %1463 }
  0xf0   :  { %v265_v29 = vadd.f32 1.0, %v1464_v28 }
  0xf2   :  { %1465 = vrcp.f32 %v265_v29 }
  0xfc   :  { %v1466_v30 = vpop.eup %1465 }
  0xfd   :  { %v269_v33 = vmul.f32 0.0, %v1466_v30 }
 0x160   :  { %v272_v31 = vpop.permute.xlu0 %271 }
 0x161   :  { %v274_v32 = vmul.f32 %v1466_v30, %v272_v31 }
 0x163   :  { %276 = vrot.lane.b32.xlu0 %v274_v32, %s1528_s19 }
 0x1d5   :  { %v277_v34 = vpop.permute.xlu0 %276 }
 0x1d6   :  { %v279_v35 = vadd.f32 %v277_v34, %v269_v33 }
 0x1d8   :  { %1467 = vtanh.f32 %v279_v35 }
 0x1e2   :  { %v1468_v36 = vpop.eup %1467 }
 0x1e3   :  { %282 = vrot.lane.b32.xlu1 %v1468_v36, %s1528_s19 }
 0x255   :  { %v283_v37 = vpop.permute.xlu1 %282 }
 0x256   :  { %v285_v38 = vmul.f32 %v1466_v30, %v283_v37 }
 0x258   :  { %287 = vrot.lane.b32.xlu1 %v285_v38, %s1529_s3 }
 0x2ca   :  { %v288_v39 = vpop.permute.xlu1 %287 }
 0x2cb   :  { %290 = vst.msk [vmem:[#allocation3] sm:$0xff] %vm187_vm3, %v288_v39  ;;  %1310 = vmatmul.mubr.msk.f32.vlgmr.msra.gmra.mrb[6].mxu1 %vm187_vm3, %v288_v39 }
 0x2cc   :  { %1418 = vmatpush3.bf16.msra.mxu1 %v1586_v6  ;;  %1331 = vmatprep.mubr.msk.f32.mxu1 %vm1526_vm2, %v1527_v14 }
 0x2cd   :  { %1419 = vmatprep.subr.bf16.mxu1 %v1525_v8 }
 0x2d0   :  { %1421 = vmatpush3.bf16.msra.mxu1 %v1608_v13 }
 0x2d1   :  { %1428 = vmatprep.subr.bf16.mxu1 %v1525_v8 }
 0x39e   :  { %v361_v41 = vpop.f32.mrb[6].mxu1 }
 0x39f   :  { %v365_v42 = vadd.f32 %v361_v41, %v141_v40  ;;  %v1311_v43 = vpop.f32.mrb[7].mxu1 }
 0x3a0   :  { %v156_v43 = vadd.f32 %v1638_v18, %v1633_v16 }
 0x3a1   :  { %1469 = vtanh.f32 %v365_v42  ;;  %v1194_v45 = vmul.f32 -1.442695, %v365_v42 }
 0x3a3   :  { %1471 = vpow2.f32 %v1194_v45 }
 0x3ab   :  { %v1470_v44 = vpop.eup %1469 }
 0x3ac   :  { %375 = vrot.lane.b32.xlu0 %v1470_v44, %s1528_s19 }
 0x3ad   :  { %v1472_v46 = vpop.eup %1471 }
 0x3ae   :  { %v369_v47 = vadd.f32 1.0, %v1472_v46 }
 0x3b0   :  { %1473 = vrcp.f32 %v369_v47 }
 0x3ba   :  { %v1474_v48 = vpop.eup %1473 }
 0x3bb   :  { %v373_v51 = vmul.f32 %v1474_v48, %v279_v35 }
 0x41e   :  { %v376_v49 = vpop.permute.xlu0 %375 }
 0x41f   :  { %v378_v50 = vmul.f32 %v1474_v48, %v376_v49 }
 0x421   :  { %380 = vrot.lane.b32.xlu1 %v378_v50, %s1528_s19 }
 0x493   :  { %v381_v52 = vpop.permute.xlu1 %380 }
 0x494   :  { %v383_v53 = vadd.f32 %v381_v52, %v373_v51 }
 0x496   :  { %1475 = vtanh.f32 %v383_v53 }
 0x4a0   :  { %v1476_v56 = vpop.eup %1475 }
 0x4a1   :  { %386 = vrot.lane.b32.xlu0 %v1476_v56, %s1528_s19 }
 0x513   :  { %v387_v57 = vpop.permute.xlu0 %386 }
 0x514   :  { %v389_v58 = vmul.f32 %v1474_v48, %v387_v57 }
 0x516   :  { %391 = vrot.lane.b32.xlu1 %v389_v58, %s1529_s3 }
 0x588   :  { %v392_v61 = vpop.permute.xlu1 %391 }
 0x589   :  { %395 = vst.msk [vmem:[#allocation3 + $0x8] sm:$0xff] %vm187_vm3, %v392_v61  ;;  %1321 = vmatmul.mubr.msk.f32.vlgmr.msra.gmra.mrb[4].mxu0 %vm187_vm3, %v392_v61 }
 0x58a   :  { %1424 = vmatpush3.bf16.msra.mxu0 %v1586_v6  ;;  %1342 = vmatprep.mubr.msk.f32.mxu0 %vm1526_vm2, %v1527_v14 }
 0x58b   :  { %1425 = vmatprep.subr.bf16.mxu0 %v1525_v8 }
 0x58e   :  { %1427 = vmatpush3.bf16.msra.mxu0 %v1608_v13 }
 0x58f   :  { %1434 = vmatprep.subr.bf16.mxu0 %v1525_v8 }
 0x65c   :  { %v466_v63 = vpop.f32.mrb[4].mxu0 }
 0x65d   :  { %v470_v0 = vadd.f32 %v466_v63, %v146_v62  ;;  %v1322_v1 = vpop.f32.mrb[5].mxu0 }
 0x65f   :  { %1477 = vtanh.f32 %v470_v0  ;;  %v1196_v3 = vmul.f32 -1.442695, %v470_v0 }
 0x661   :  { %1479 = vpow2.f32 %v1196_v3 }
 0x669   :  { %v1478_v2 = vpop.eup %1477 }
 0x66a   :  { %480 = vrot.lane.b32.xlu0 %v1478_v2, %s1528_s19 }
 0x66b   :  { %v1480_v4 = vpop.eup %1479 }
 0x66c   :  { %v474_v5 = vadd.f32 1.0, %v1480_v4 }
 0x66e   :  { %1481 = vrcp.f32 %v474_v5  ;;  %v1034_v5 = vld [vmem:[%s1814_s4] sm:$0xff] }
 0x678   :  { %v1482_v7 = vpop.eup %1481 }
 0x679   :  { %v478_v11 = vmul.f32 %v1482_v7, %v383_v53 }
 0x6dc   :  { %v481_v9 = vpop.permute.xlu0 %480 }
 0x6dd   :  { %v483_v10 = vmul.f32 %v1482_v7, %v481_v9 }
 0x6df   :  { %485 = vrot.lane.b32.xlu1 %v483_v10, %s1528_s19 }
 0x751   :  { %v486_v12 = vpop.permute.xlu1 %485 }
 0x752   :  { %v488_v17 = vadd.f32 %v486_v12, %v478_v11 }
 0x754   :  { %1483 = vtanh.f32 %v488_v17 }
 0x75e   :  { %v1484_v20 = vpop.eup %1483 }
 0x75f   :  { %491 = vrot.lane.b32.xlu0 %v1484_v20, %s1528_s19  ;;  %v1037_v20 = vld [vmem:[%s1814_s4 + $0x18] sm:$0xff] }
 0x7d1   :  { %v492_v22 = vpop.permute.xlu0 %491 }
 0x7d2   :  { %v494_v23 = vmul.f32 %v1482_v7, %v492_v22  ;;  %v1035_v7 = vld [vmem:[%s1814_s4 + $0x8] sm:$0xff] }
 0x7d3   :  { %v1446_v9 = vpack.c.bf16 %v1035_v7, %v1034_v5 }
 0x7d4   :  { %496 = vrot.lane.b32.xlu1 %v494_v23, %s1529_s3 }
 0x846   :  { %v497_v24 = vpop.permute.xlu1 %496 }
 0x847   :  { %500 = vst.msk [vmem:[#allocation3 + $0x10] sm:$0xff] %vm187_vm3, %v497_v24  ;;  %1332 = vmatmul.mubr.msk.f32.vlgmr.msra.gmra.mrb[8].mxu1 %vm187_vm3, %v497_v24  ;;  %v1026_v24 = vld [vmem:[#allocation3] sm:$0xff] }
 0x848   :  { %1430 = vmatpush3.bf16.msra.mxu1 %v1586_v6  ;;  %1353 = vmatprep.mubr.msk.f32.mxu1 %vm1526_vm2, %v1527_v14 }
 0x849   :  { %1431 = vmatprep.subr.bf16.mxu1 %v1525_v8 }
 0x84c   :  { %1433 = vmatpush3.bf16.msra.mxu1 %v1608_v13 }
 0x84d   :  { %1440 = vmatprep.subr.bf16.mxu1 %v1525_v8 }
 0x91a   :  { %v571_v26 = vpop.f32.mrb[8].mxu1 }
 0x91b   :  { %v575_v27 = vadd.f32 %v571_v26, %v151_v25  ;;  %v1333_v28 = vpop.f32.mrb[9].mxu1  ;;  %v1027_v25 = vld [vmem:[#allocation3 + $0x8] sm:$0xff]  ;;  %v1028_v26 = vld [vmem:[#allocation3 + $0x10] sm:$0xff] }
 0x91d   :  { %1485 = vtanh.f32 %v575_v27  ;;  %v1198_v30 = vmul.f32 -1.442695, %v575_v27 }
 0x91f   :  { %1487 = vpow2.f32 %v1198_v30  ;;  %v166_v30 = vadd.f32 %v1638_v18, %v1642_v21 }
 0x927   :  { %v1486_v29 = vpop.eup %1485 }
 0x928   :  { %585 = vrot.lane.b32.xlu0 %v1486_v29, %s1528_s19 }
 0x929   :  { %v1488_v31 = vpop.eup %1487 }
 0x92a   :  { %v579_v32 = vadd.f32 1.0, %v1488_v31 }
 0x92c   :  { %1489 = vrcp.f32 %v579_v32 }
 0x936   :  { %v1490_v33 = vpop.eup %1489 }
 0x937   :  { %v583_v36 = vmul.f32 %v1490_v33, %v488_v17  ;;  %v1036_v17 = vld [vmem:[%s1814_s4 + $0x10] sm:$0xff] }
 0x938   :  { %v1450_v22 = vpack.c.bf16 %v1037_v20, %v1036_v17 }
 0x99a   :  { %v586_v34 = vpop.permute.xlu0 %585 }
 0x99b   :  { %v588_v35 = vmul.f32 %v1490_v33, %v586_v34  ;;  %v1752_v34 = vstv %s1815_s5 }
 0x99d   :  { %590 = vrot.lane.b32.xlu1 %v588_v35, %s1528_s19 }
 0xa0f   :  { %v591_v37 = vpop.permute.xlu1 %590 }
 0xa10   :  { %v593_v38 = vadd.f32 %v591_v37, %v583_v36 }
 0xa12   :  { %1491 = vtanh.f32 %v593_v38 }
 0xa1c   :  { %v1492_v39 = vpop.eup %1491 }
 0xa1d   :  { %596 = vrot.lane.b32.xlu0 %v1492_v39, %s1528_s19 }
 0xa8f   :  { %v597_v40 = vpop.permute.xlu0 %596 }
 0xa90   :  { %v599_v41 = vmul.f32 %v1490_v33, %v597_v40 }
 0xa92   :  { %601 = vrot.lane.b32.xlu1 %v599_v41, %s1529_s3 }
 0xb04   :  { %v602_v42 = vpop.permute.xlu1 %601 }
 0xb05   :  { %605 = vst.msk [vmem:[#allocation3 + $0x18] sm:$0xff] %vm187_vm3, %v602_v42  ;;  %1343 = vmatmul.mubr.msk.f32.vlgmr.msra.gmra.mrb[6].mxu0 %vm187_vm3, %v602_v42 }
 0xb06   :  { %1436 = vmatpush3.bf16.msra.mxu0 %v1586_v6  ;;  %1364 = vmatprep.mubr.msk.f32.mxu0 %vm1526_vm2, %v1527_v14 }
 0xb07   :  { %1437 = vmatprep.subr.bf16.mxu0 %v1525_v8 }
 0xb0a   :  { %1439 = vmatpush3.bf16.msra.mxu0 %v1608_v13 }
 0xb0b   :  { %1447 = vmatprep.subr.bf16.mxu0 %v1446_v9 }
 0xb0c   :  { %v1029_v27 = vld [vmem:[#allocation3 + $0x18] sm:$0xff] }
 0xbd8   :  { %v676_v44 = vpop.f32.mrb[6].mxu0 }
 0xbd9   :  { %v680_v45 = vadd.f32 %v676_v44, %v156_v43  ;;  %v1344_v46 = vpop.f32.mrb[7].mxu0 }
 0xbdb   :  { %1493 = vtanh.f32 %v680_v45  ;;  %v1200_v48 = vmul.f32 -1.442695, %v680_v45 }
 0xbdd   :  { %1495 = vpow2.f32 %v1200_v48 }
 0xbe5   :  { %v1494_v47 = vpop.eup %1493 }
 0xbe6   :  { %690 = vrot.lane.b32.xlu0 %v1494_v47, %s1528_s19 }
 0xbe7   :  { %v1496_v49 = vpop.eup %1495 }
 0xbe8   :  { %v684_v50 = vadd.f32 1.0, %v1496_v49 }
 0xbea   :  { %1497 = vrcp.f32 %v684_v50 }
 0xbf4   :  { %v1498_v51 = vpop.eup %1497 }
 0xbf5   :  { %v688_v54 = vmul.f32 %v1498_v51, %v593_v38 }
 0xc58   :  { %v691_v52 = vpop.permute.xlu0 %690 }
 0xc59   :  { %v693_v53 = vmul.f32 %v1498_v51, %v691_v52 }
 0xc5b   :  { %695 = vrot.lane.b32.xlu1 %v693_v53, %s1528_s19 }
 0xccd   :  { %v696_v55 = vpop.permute.xlu1 %695 }
 0xcce   :  { %v698_v16 = vadd.f32 %v696_v55, %v688_v54 }
 0xcd0   :  { %1499 = vtanh.f32 %v698_v16 }
 0xcda   :  { %v1500_v56 = vpop.eup %1499 }
 0xcdb   :  { %701 = vrot.lane.b32.xlu0 %v1500_v56, %s1528_s19 }
 0xd4d   :  { %v702_v57 = vpop.permute.xlu0 %701 }
 0xd4e   :  { %v704_v58 = vmul.f32 %v1498_v51, %v702_v57 }
 0xd50   :  { %706 = vrot.lane.b32.xlu1 %v704_v58, %s1529_s3 }
 0xdc2   :  { %v707_v59 = vpop.permute.xlu1 %706 }
 0xdc3   :  { %710 = vst.msk [vmem:[#allocation3 + $0x20] sm:$0xff] %vm187_vm3, %v707_v59  ;;  %1354 = vmatmul.mubr.msk.f32.vlgmr.msra.gmra.mrb[10].mxu1 %vm187_vm3, %v707_v59 }
 0xdc4   :  { %1442 = vmatpush3.bf16.msra.mxu1 %v1586_v6  ;;  %1375 = vmatprep.mubr.msk.f32.mxu1 %vm1526_vm2, %v1527_v14 }
 0xdc5   :  { %1443 = vmatprep.subr.bf16.mxu1 %v1525_v8 }
 0xdc8   :  { %1445 = vmatpush3.bf16.msra.mxu1 %v1608_v13 }
 0xdca   :  { %v1030_v28 = vld [vmem:[#allocation3 + $0x20] sm:$0xff] }
 0xe96   :  { %v781_v61 = vpop.f32.mrb[10].mxu1 }
 0xe97   :  { %v785_v62 = vadd.f32 %v781_v61, %v161_v60  ;;  %v1355_v63 = vpop.f32.mrb[11].mxu1  ;;  %v171_v60 = vadd.f32 %v1640_v19, %v1638_v18 }
 0xe99   :  { %1501 = vtanh.f32 %v785_v62  ;;  %v1202_v1 = vmul.f32 -1.442695, %v785_v62 }
 0xe9b   :  { %1503 = vpow2.f32 %v1202_v1 }
 0xea3   :  { %v1502_v0 = vpop.eup %1501 }
 0xea4   :  { %795 = vrot.lane.b32.xlu0 %v1502_v0, %s1528_s19 }
 0xea5   :  { %v1504_v6 = vpop.eup %1503 }
 0xea6   :  { %v789_v2 = vadd.f32 1.0, %v1504_v6 }
 0xea8   :  { %1505 = vrcp.f32 %v789_v2 }
 0xeb2   :  { %v1506_v14 = vpop.eup %1505 }
 0xeb3   :  { %v793_v13 = vmul.f32 %v1506_v14, %v698_v16 }
 0xf16   :  { %v796_v3 = vpop.permute.xlu0 %795 }
 0xf17   :  { %v798_v8 = vmul.f32 %v1506_v14, %v796_v3 }
 0xf19   :  { %800 = vrot.lane.b32.xlu1 %v798_v8, %s1528_s19 }
 0xf8b   :  { %v801_v4 = vpop.permute.xlu1 %800 }
 0xf8c   :  { %v1722_v15 = vadd.f32 %v801_v4, %v793_v13 }
 0xf8e   :  { %1507 = vtanh.f32 %v1722_v15 }
 0xf98   :  { %v1508_v10 = vpop.eup %1507 }
 0xf99   :  { %806 = vrot.lane.b32.xlu0 %v1508_v10, %s1528_s19 }
0x100b   :  { %v807_v11 = vpop.permute.xlu0 %806 }
0x100c   :  { %v809_v12 = vmul.f32 %v1506_v14, %v807_v11 }
0x100e   :  { %811 = vrot.lane.b32.xlu1 %v809_v12, %s1529_s3 }
0x1080   :  { %v812_v23 = vpop.permute.xlu1 %811 }
0x1081   :  { %815 = vst.msk [vmem:[#allocation3 + $0x28] sm:$0xff] %vm187_vm3, %v812_v23  ;;  %1365 = vmatmul.mubr.msk.f32.vlgmr.msra.gmra.mrb[8].mxu0 %vm187_vm3, %v812_v23 }
0x1082   :  { %1449 = vmatpush3.bf16.msra.mxu0 %v1446_v9  ;;  %1386 = vmatprep.mubr.msk.f32.mxu0 %vm187_vm3, %v1026_v24 }
0x1083   :  { %1451 = vmatprep.subr.bf16.mxu0 %v1450_v22 }
0x1086   :  { %1453 = vmatpush3.bf16.msra.mxu0 %v1450_v22 }
0x1088   :  { %v1031_v29 = vld [vmem:[#allocation3 + $0x28] sm:$0xff] }
0x1089   :  { %1387 = vmatmul.mubr.msk.f32.vlgmr.msra.gmra.mrb[10].mxu0 %vm187_vm3, %v1027_v25 }
0x108a   :  { %1389 = vmatprep.mubr.msk.f32.mxu0 %vm187_vm3, %v1028_v26 }
0x108d   :  { %1390 = vmatmul.mubr.msk.f32.gmra.mrb[12].mxu0 %vm187_vm3, %v1029_v27 }
0x108e   :  { %1392 = vmatprep.mubr.msk.f32.mxu0 %vm187_vm3, %v1030_v28 }
0x1091   :  { %1393 = vmatmul.mubr.msk.f32.gmra.mrb[14].mxu0 %vm187_vm3, %v1031_v29 }
0x1154   :  { %v886_v31 = vpop.f32.mrb[8].mxu0 }
0x1155   :  { %v890_v32 = vadd.f32 %v886_v31, %v166_v30  ;;  %v1366_v33 = vpop.f32.mrb[9].mxu0 }
0x1157   :  { %1509 = vtanh.f32 %v890_v32  ;;  %v1204_v47 = vmul.f32 -1.442695, %v890_v32 }
0x1159   :  { %1511 = vpow2.f32 %v1204_v47 }
0x115c   :  { %v1388_v35 = vpop.f32.mrb[10].mxu0 }
0x115d   :  { %v1136_v36 = vadd.f32 %v1388_v35, %v1752_v34  ;;  %v1130_v37 = vpop.f32.mrb[11].mxu0 }
0x115e   :  { %v1131_v38 = vadd.f32 %v1130_v37, %v1752_v34 }
0x115f   :  { %1171 = vst.msk [vmem:[%s1816_s6 + $0x8] sm:$0xff] %vm1169_vm4, %v1136_v36 }
0x1160   :  { %1170 = vst.msk [vmem:[%s1816_s6] sm:$0xff] %vm1169_vm4, %v1131_v38  ;;  %v1391_v21 = vpop.f32.mrb[12].mxu0 }
0x1161   :  { %v1510_v39 = vpop.eup %1509  ;;  %v1146_v40 = vadd.f32 %v1391_v21, %v1752_v34  ;;  %v1140_v41 = vpop.f32.mrb[13].mxu0 }
0x1162   :  { %v1141_v42 = vadd.f32 %v1140_v41, %v1752_v34  ;;  %900 = vrot.lane.b32.xlu0 %v1510_v39, %s1528_s19 }
0x1163   :  { %1173 = vst.msk [vmem:[%s1816_s6 + $0x18] sm:$0xff] %vm1169_vm4, %v1146_v40  ;;  %v1512_v48 = vpop.eup %1511 }
0x1164   :  { %1172 = vst.msk [vmem:[%s1816_s6 + $0x10] sm:$0xff] %vm1169_vm4, %v1141_v42  ;;  %v1394_v43 = vpop.f32.mrb[14].mxu0  ;;  %v894_v49 = vadd.f32 1.0, %v1512_v48 }
0x1165   :  { %v1156_v44 = vadd.f32 %v1394_v43, %v1752_v34  ;;  %v1150_v45 = vpop.f32.mrb[15].mxu0 }
0x1166   :  { %v1151_v46 = vadd.f32 %v1150_v45, %v1752_v34  ;;  %1513 = vrcp.f32 %v894_v49 }
0x1167   :  { %1175 = vst.msk [vmem:[%s1816_s6 + $0x28] sm:$0xff] %vm1169_vm4, %v1156_v44 }
0x1168   :  { %1174 = vst.msk [vmem:[%s1816_s6 + $0x20] sm:$0xff] %vm1169_vm4, %v1151_v46 }
0x1170   :  { %v1514_v50 = vpop.eup %1513 }
0x1171   :  { %v898_v53 = vmul.f32 %v1514_v50, %v1722_v15 }
0x11d4   :  { %v901_v51 = vpop.permute.xlu0 %900 }
0x11d5   :  { %v903_v52 = vmul.f32 %v1514_v50, %v901_v51 }
0x11d7   :  { %905 = vrot.lane.b32.xlu1 %v903_v52, %s1528_s19 }
0x1249   :  { %v906_v54 = vpop.permute.xlu1 %905 }
0x124a   :  { %v908_v55 = vadd.f32 %v906_v54, %v898_v53 }
0x124c   :  { %1515 = vtanh.f32 %v908_v55 }
0x1256   :  { %v1516_v16 = vpop.eup %1515 }
0x1257   :  { %911 = vrot.lane.b32.xlu0 %v1516_v16, %s1528_s19 }
0x12c9   :  { %v912_v56 = vpop.permute.xlu0 %911 }
0x12ca   :  { %v914_v57 = vmul.f32 %v1514_v50, %v912_v56 }
0x12cc   :  { %916 = vrot.lane.b32.xlu1 %v914_v57, %s1529_s3 }
0x133e   :  { %v917_v58 = vpop.permute.xlu1 %916 }
0x133f   :  { %920 = vst.msk [vmem:[#allocation3 + $0x30] sm:$0xff] %vm187_vm3, %v917_v58  ;;  %1376 = vmatmul.mubr.msk.f32.vlgmr.msra.gmra.mrb[12].mxu1 %vm187_vm3, %v917_v58 }
0x1346   :  { %v1032_v59 = vld [vmem:[#allocation3 + $0x30] sm:$0xff] }
0x1347   :  { %1395 = vmatprep.mubr.msk.f32.mxu0 %vm187_vm3, %v1032_v59 }
0x1412   :  { %v991_v61 = vpop.f32.mrb[12].mxu1 }
0x1413   :  { %v995_v62 = vadd.f32 %v991_v61, %v171_v60  ;;  %v1377_v63 = vpop.f32.mrb[13].mxu1 }
0x1415   :  { %1517 = vtanh.f32 %v995_v62  ;;  %v1206_v1 = vmul.f32 -1.442695, %v995_v62 }
0x1417   :  { %1519 = vpow2.f32 %v1206_v1 }
0x141f   :  { %v1518_v0 = vpop.eup %1517 }
0x1420   :  { %1005 = vrot.lane.b32.xlu0 %v1518_v0, %s1528_s19 }
0x1421   :  { %v1520_v6 = vpop.eup %1519 }
0x1422   :  { %v999_v2 = vadd.f32 1.0, %v1520_v6 }
0x1424   :  { %1521 = vrcp.f32 %v999_v2 }
0x142e   :  { %v1522_v14 = vpop.eup %1521 }
0x142f   :  { %v1003_v13 = vmul.f32 %v1522_v14, %v908_v55 }
0x1492   :  { %v1006_v3 = vpop.permute.xlu0 %1005 }
0x1493   :  { %v1008_v8 = vmul.f32 %v1522_v14, %v1006_v3 }
0x1495   :  { %1010 = vrot.lane.b32.xlu1 %v1008_v8, %s1528_s19 }
0x1507   :  { %v1011_v4 = vpop.permute.xlu1 %1010 }
0x1508   :  { %v1013_v18 = vadd.f32 %v1011_v4, %v1003_v13 }
0x150a   :  { %1523 = vtanh.f32 %v1013_v18 }
0x1514   :  { %v1524_v19 = vpop.eup %1523 }
0x1515   :  { %1016 = vrot.lane.b32.xlu0 %v1524_v19, %s1528_s19 }
0x1587   :  { %v1017_v15 = vpop.permute.xlu0 %1016 }
0x1588   :  { %v1019_v5 = vmul.f32 %v1522_v14, %v1017_v15 }
0x158a   :  { %1021 = vrot.lane.b32.xlu1 %v1019_v5, %s1529_s3 }
0x15fc   :  { %v1022_v7 = vpop.permute.xlu1 %1021 }
0x15fd   :  { %1025 = vst.msk [vmem:[#allocation3 + $0x38] sm:$0xff] %vm187_vm3, %v1022_v7 }
0x1604   :  { %v1033_v9 = vld [vmem:[#allocation3 + $0x38] sm:$0xff] }
0x1605   :  { %1396 = vmatmul.mubr.msk.f32.gmra.mrb[16].mxu0 %vm187_vm3, %v1033_v9 }
0x16d8   :  { %v1397_v10 = vpop.f32.mrb[16].mxu0 }
0x16d9   :  { %v1166_v11 = vadd.f32 %v1397_v10, %v1752_v34  ;;  %v1160_v12 = vpop.f32.mrb[17].mxu0 }
0x16da   :  { %v1161_v17 = vadd.f32 %v1160_v12, %v1752_v34 }
0x16db   :  { %1177 = vst.msk [vmem:[%s1816_s6 + $0x38] sm:$0xff] %vm1169_vm4, %v1166_v11 }
0x16dc   :  { %1176 = vst.msk [vmem:[%s1816_s6 + $0x30] sm:$0xff] %vm1169_vm4, %v1161_v17 }

</bundles_post_ra>
